<compile_context>
chip_gen: v5e
topology: v5e:2x2
jax: 0.10.0
libtpu: 0.0.40
codegen_flags: <defaults>
</compile_context>

<pallas_src>
import functools
import math

import jax
import jax.numpy as jnp
from jax import lax
from jax.experimental import pallas as pl
from jax.experimental.pallas import tpu as pltpu


def _self_attention_kernel(q_ref, k_ref, v_ref, w_ref, b_ref, o_ref,
                           q_cache, k_cache, v_cache, m_sc, l_sc, acc_sc,
                           *, scale, approx_reciprocal):
    # q_ref: (bb, tq, E); k_ref/v_ref: (bb, tk, E)
    # w_ref: (3, E, E) stored (in, out), full copy in VMEM; b_ref: (3, 1, E)
    qi = pl.program_id(1)
    ki = pl.program_id(2)
    num_k = pl.num_programs(2)

    bb, tq, E = q_ref.shape
    _, tk, _ = k_ref.shape
    compute_dtype = q_ref.dtype      # bf16 in -> bf16 MXU operands, f32 accum

    def project(x_ref, idx, post_scale=None):
        rows = x_ref.shape[1]
        x2d = x_ref[...].reshape(bb * rows, E)            # fill MXU rows
        y = jnp.dot(x2d, w_ref[idx],                      # native-dtype in,
                    preferred_element_type=jnp.float32)   # f32 accumulate
        y = y + b_ref[idx].astype(jnp.float32)            # (1, E) broadcast
        if post_scale is not None:
            y = y * post_scale
        return y.reshape(bb, rows, E).astype(compute_dtype)

    # --- Project K/V tile `ki` exactly once per batch block (first q sweep) and
    #     cache in VMEM; later query tiles reuse the cache (no redundant FLOPs).
    @pl.when(qi == 0)
    def _():
        k_cache[ki] = project(k_ref, 1)
        v_cache[ki] = project(v_ref, 2)

    # --- Project Q tile once per (batch, q-tile); fold 1/sqrt(E) into Q; init
    #     the online-softmax carry.
    @pl.when(ki == 0)
    def _():
        q_cache[...] = project(q_ref, 0, post_scale=scale)
        m_sc[...] = jnp.full(m_sc.shape, -1e30, dtype=m_sc.dtype)
        l_sc[...] = jnp.zeros(l_sc.shape, dtype=l_sc.dtype)
        acc_sc[...] = jnp.zeros(acc_sc.shape, dtype=acc_sc.dtype)

    # --- Online-softmax step over the cached (projected) K/V tile `ki`. -------
    q = q_cache[...]
    k = k_cache[ki]
    v = v_cache[ki]

    # Scores: contract embed dims, batch over b — no explicit K transpose.
    s = lax.dot_general(q, k, (((2,), (2,)), ((0,), (0,))),
                        preferred_element_type=jnp.float32)      # (bb, tq, tk)

    m_prev = m_sc[...]
    m_new = jnp.maximum(m_prev, jnp.max(s, axis=-1, keepdims=True))
    alpha = jnp.exp(m_prev - m_new)
    p = jnp.exp(s - m_new)                                        # f32
    l_sc[...] = alpha * l_sc[...] + jnp.sum(p, axis=-1, keepdims=True)
    acc_sc[...] = alpha * acc_sc[...] + lax.dot_general(
        p.astype(compute_dtype), v, (((2,), (1,)), ((0,), (0,))),
        preferred_element_type=jnp.float32)                       # (bb, tq, E)
    m_sc[...] = m_new

    # --- Finalize & write the output tile after the last KV block. -----------
    @pl.when(ki == num_k - 1)
    def _():
        if approx_reciprocal:
            out = acc_sc[...] * pl.reciprocal(l_sc[...], approx=True)  # EUP vrcp
        else:
            out = acc_sc[...] / l_sc[...]          # exact parity with F.softmax
        o_ref[...] = out.astype(o_ref.dtype)


def _sublane_multiple(dtype):
    # f32 -> 8, bf16 -> 16, int8/fp8 -> 32 (sub-32-bit dtypes pack along sublanes).
    return (8 * 4) // jnp.dtype(dtype).itemsize


def _pick_tile(S, target, sub):
    """Largest multiple of `sub` that divides S and is <= target (else full S)."""
    t = min(target, S)
    t -= t % sub
    while t >= sub:
        if S % t == 0:
            return t
        t -= sub
    return S


def self_attention(query, key, value, params, *, block_b=None, block_q=None,
                   block_k=None, vmem_limit_bytes=None,
                   approx_reciprocal=False):
    """query/key/value: (B, S, E). params: {'w_qkv': (3,E,E) (in,out), 'b_qkv': (3,1,E)}."""
    B, S, E = query.shape
    w_qkv = params["w_qkv"]
    b_qkv = params["b_qkv"]

    sub = _sublane_multiple(query.dtype)
    if block_b is None:
        block_b = 1 if B > 1 else B     # >=2 parallel batch blocks keeps both v7x TCs busy
    if block_q is None:
        block_q = _pick_tile(S, 256, sub)   # MXU-friendly M tile (128 is enough on v5e)
    if block_k is None:
        block_k = _pick_tile(S, 512, sub)

    assert B % block_b == 0, "block_b must divide batch"
    assert S % block_q == 0 and S % block_k == 0, "q/k tiles must divide seq"
    assert block_q == S or block_q % sub == 0, "query tile must be sublane-aligned for dtype"
    assert block_k == S or block_k % sub == 0, "kv tile must be sublane-aligned for dtype"
    # NOTE: E not a multiple of 128 is still correct (full-dim block exception)
    # but under-utilises lanes / forces masked stores; pad E or fold heads into
    # the last dim in the surrounding model code for peak throughput.

    grid = (B // block_b, S // block_q, S // block_k)
    num_k = grid[2]

    q_spec = pl.BlockSpec((block_b, block_q, E), lambda b, qi, ki: (b, qi, 0))
    out_spec = pl.BlockSpec((block_b, block_q, E), lambda b, qi, ki: (b, qi, 0))
    # K/V inputs are only consumed during the first query-tile sweep (qi == 0);
    # pinning the block index afterwards lets the pipeliner skip the re-fetch.
    kv_index = lambda b, qi, ki: (b, jnp.where(qi == 0, ki, 0), 0)
    kv_spec = pl.BlockSpec((block_b, block_k, E), kv_index)
    # Grid-invariant params: one full copy in VMEM, no double-buffered stream.
    w_spec = pl.BlockSpec(memory_space=pltpu.MemorySpace.VMEM)
    bias_spec = pl.BlockSpec(memory_space=pltpu.MemorySpace.VMEM)

    compute_dtype = query.dtype
    scratch_shapes = [
        pltpu.VMEM((block_b, block_q, E), compute_dtype),          # projected Q tile
        pltpu.VMEM((num_k, block_b, block_k, E), compute_dtype),   # projected K cache
        pltpu.VMEM((num_k, block_b, block_k, E), compute_dtype),   # projected V cache
        pltpu.VMEM((block_b, block_q, 1), jnp.float32),            # running max
        pltpu.VMEM((block_b, block_q, 1), jnp.float32),            # running sum
        pltpu.VMEM((block_b, block_q, E), jnp.float32),            # output accumulator
    ]

    kernel = functools.partial(
        _self_attention_kernel,
        scale=1.0 / math.sqrt(float(E)),
        approx_reciprocal=approx_reciprocal)

    # TODO(synk): when query is key is value (classic self-attention), pass the
    # activation once and share a single input stream to cut HBM reads ~3x.
    return pl.pallas_call(
        kernel,
        out_shape=jax.ShapeDtypeStruct((B, S, E), query.dtype),
        grid_spec=pltpu.PrefetchScalarGridSpec(
            num_scalar_prefetch=0,
            grid=grid,
            in_specs=[q_spec, kv_spec, kv_spec, w_spec, bias_spec],
            out_specs=out_spec,
            scratch_shapes=scratch_shapes,
        ),
        compiler_params=pltpu.CompilerParams(
            # batch is embarrassingly parallel (v7x megacore sharding); the q and
            # kv axes carry VMEM state (K/V caches, online-softmax accumulators).
            dimension_semantics=("parallel", "arbitrary", "arbitrary"),
            vmem_limit_bytes=vmem_limit_bytes),
    )(query, key, value, w_qkv, b_qkv)


def init_params(key, embed_size):
    """PyTorch-style nn.Linear init: weights (out, in), biases (E,), U(-1/sqrt(E), 1/sqrt(E))."""
    bound = 1.0 / math.sqrt(embed_size)
    keys = jax.random.split(key, 6)
    u = lambda k, shape: jax.random.uniform(
        k, shape, dtype=jnp.float32, minval=-bound, maxval=bound)
    return {
        "wq": u(keys[0], (embed_size, embed_size)),
        "bq": u(keys[1], (embed_size,)),
        "wk": u(keys[2], (embed_size, embed_size)),
        "bk": u(keys[3], (embed_size,)),
        "wv": u(keys[4], (embed_size, embed_size)),
        "bv": u(keys[5], (embed_size,)),
    }


def fuse_params(p):
    """Wrapper-side layout plumbing (done once, outside the hot loop):
    transpose each weight to (in, out) and stack Q/K/V into single operands."""
    w_qkv = jnp.stack([p["wq"].T, p["wk"].T, p["wv"].T], axis=0)            # (3, E, E)
    b_qkv = jnp.stack([p["bq"][None, :], p["bk"][None, :], p["bv"][None, :]],
                      axis=0)                                               # (3, 1, E)
    return {"w_qkv": w_qkv, "b_qkv": b_qkv}


def _reference(query, key, value, p):
    """Plain-JAX reference mirroring the PyTorch forward (PyTorch-layout params)."""
    q = query @ p["wq"].T + p["bq"]
    k = key @ p["wk"].T + p["bk"]
    v = value @ p["wv"].T + p["bv"]
    E = q.shape[-1]
    scores = jnp.einsum("bqe,bke->bqk", q, k) / jnp.sqrt(jnp.float32(E))
    attn = jax.nn.softmax(scores, axis=-1)
    return jnp.einsum("bqk,bke->bqe", attn, v)


if __name__ == "__main__":
    B, S, E = 2, 32, 32
    root = jax.random.PRNGKey(0)
    kq, kk, kv, kp = jax.random.split(root, 4)

    query = jax.random.normal(kq, (B, S, E), dtype=jnp.float32)
    key = jax.random.normal(kk, (B, S, E), dtype=jnp.float32)
    value = jax.random.normal(kv, (B, S, E), dtype=jnp.float32)

    torch_style_params = init_params(kp, E)
    fused_params = fuse_params(torch_style_params)
    ref = _reference(query, key, value, torch_style_params)

    # f32 path, tiled so the K/V caching and online-softmax branches are exercised
    # (grid = (2 batch, 2 q-tiles, 2 kv-tiles)).
    out = self_attention(query, key, value, fused_params,
                         block_b=1, block_q=16, block_k=16)
    out = jax.block_until_ready(out)
    assert out.shape == (B, S, E)
    assert jnp.allclose(out, ref, atol=1e-4, rtol=1e-4), "f32 mismatch vs reference"

    # bf16 path: native-dtype MXU operands (fast path) with dtype-aware sublane alignment.
    q16, k16, v16 = (x.astype(jnp.bfloat16) for x in (query, key, value))
    fused16 = jax.tree_util.tree_map(lambda a: a.astype(jnp.bfloat16), fused_params)
    out16 = self_attention(q16, k16, v16, fused16,
                           block_b=1, block_q=16, block_k=16)
    out16 = jax.block_until_ready(out16)
    assert jnp.allclose(out16.astype(jnp.float32), ref, atol=5e-2, rtol=5e-2), \
        "bf16 mismatch vs reference"

    print("KERNEL_OK")
</pallas_src>

<mosaic_0001>
module attributes {stable_mosaic.version = 11 : i64} {
  func.func @_self_attention_kernel(%arg0: i32, %arg1: i32, %arg2: i32, %arg3: memref<1x16x32xf32, #tpu.memory_space<vmem>>, %arg4: memref<1x16x32xf32, #tpu.memory_space<vmem>>, %arg5: memref<1x16x32xf32, #tpu.memory_space<vmem>>, %arg6: memref<3x32x32xf32, #tpu.memory_space<vmem>>, %arg7: memref<3x1x32xf32, #tpu.memory_space<vmem>>, %arg8: memref<1x16x32xf32, #tpu.memory_space<vmem>>, %arg9: memref<1x16x32xf32, #tpu.memory_space<vmem>>, %arg10: memref<2x1x16x32xf32, #tpu.memory_space<vmem>>, %arg11: memref<2x1x16x32xf32, #tpu.memory_space<vmem>>, %arg12: memref<1x16x1xf32, #tpu.memory_space<vmem>>, %arg13: memref<1x16x1xf32, #tpu.memory_space<vmem>>, %arg14: memref<1x16x32xf32, #tpu.memory_space<vmem>>) attributes {dimension_semantics = [#tpu.dimension_semantics<parallel>, #tpu.dimension_semantics<arbitrary>, #tpu.dimension_semantics<arbitrary>], iteration_bounds = array<i64: 2, 2, 2>, scalar_prefetch = 0 : i64, scratch_operands = 6 : i64, tpu.core_type = #tpu.core_type<tc>, window_params = [{transform_indices = @transform_0, window_bounds = array<i64: 1, 16, 32>}, {transform_indices = @transform_1, window_bounds = array<i64: 1, 16, 32>}, {transform_indices = @transform_2, window_bounds = array<i64: 1, 16, 32>}, {pipeline_mode = #tpu.pipeline_mode<synchronous>, transform_indices = @transform_3, window_bounds = array<i64: 3, 32, 32>}, {pipeline_mode = #tpu.pipeline_mode<synchronous>, transform_indices = @transform_4, window_bounds = array<i64: 3, 1, 32>}, {transform_indices = @transform_5, window_bounds = array<i64: 1, 16, 32>}]} {
    %c0_i32 = arith.constant 0 : i32
    %0 = arith.cmpi eq, %arg1, %c0_i32 : i32
    %1 = arith.extui %0 : i1 to i32
    %c0_i32_0 = arith.constant 0 : i32
    %2 = arith.cmpi ne, %1, %c0_i32_0 : i32
    scf.if %2 {
      %c0_33 = arith.constant 0 : index
      %c0_34 = arith.constant 0 : index
      %c0_35 = arith.constant 0 : index
      %39 = vector.load %arg4[%c0_33, %c0_34, %c0_35] : memref<1x16x32xf32, #tpu.memory_space<vmem>>, vector<1x16x32xf32>
      %40 = vector.shape_cast %39 : vector<1x16x32xf32> to vector<16x32xf32>
      %c1 = arith.constant 1 : index
      %c0_36 = arith.constant 0 : index
      %c0_37 = arith.constant 0 : index
      %41 = vector.load %arg6[%c1, %c0_36, %c0_37] : memref<3x32x32xf32, #tpu.memory_space<vmem>>, vector<1x32x32xf32>
      %42 = vector.shape_cast %41 : vector<1x32x32xf32> to vector<32x32xf32>
      %cst_38 = arith.constant dense<0.000000e+00> : vector<16x32xf32>
      %43 = tpu.matmul %40, %42, %cst_38 {dimension_numbers = #tpu.dot_dimension_numbers<[1], [0], [0], [1], [0, 0, 1, 1], [], []>} : vector<16x32xf32>, vector<32x32xf32>, vector<16x32xf32> -> vector<16x32xf32>
      %c1_39 = arith.constant 1 : index
      %c0_40 = arith.constant 0 : index
      %c0_41 = arith.constant 0 : index
      %44 = vector.load %arg7[%c1_39, %c0_40, %c0_41] : memref<3x1x32xf32, #tpu.memory_space<vmem>>, vector<1x1x32xf32>
      %45 = vector.shape_cast %44 : vector<1x1x32xf32> to vector<1x32xf32>
      %46 = vector.broadcast %45 : vector<1x32xf32> to vector<16x32xf32>
      %47 = arith.addf %43, %46 : vector<16x32xf32>
      %48 = vector.shape_cast %47 : vector<16x32xf32> to vector<1x16x32xf32>
      %49 = arith.index_cast %arg2 : i32 to index
      %c0_42 = arith.constant 0 : index
      %c0_43 = arith.constant 0 : index
      %c0_44 = arith.constant 0 : index
      %50 = vector.load %arg10[%49, %c0_42, %c0_43, %c0_44] : memref<2x1x16x32xf32, #tpu.memory_space<vmem>>, vector<1x1x16x32xf32>
      %51 = vector.shape_cast %50 : vector<1x1x16x32xf32> to vector<1x16x32xf32>
      %52 = vector.shape_cast %48 : vector<1x16x32xf32> to vector<1x1x16x32xf32>
      tpu.vector_store %arg10[%49, %c0_42, %c0_43, %c0_44], %52 {strides = array<i32>} : memref<2x1x16x32xf32, #tpu.memory_space<vmem>>, vector<1x1x16x32xf32>,
      %c0_45 = arith.constant 0 : index
      %c0_46 = arith.constant 0 : index
      %c0_47 = arith.constant 0 : index
      %53 = vector.load %arg5[%c0_45, %c0_46, %c0_47] : memref<1x16x32xf32, #tpu.memory_space<vmem>>, vector<1x16x32xf32>
      %54 = vector.shape_cast %53 : vector<1x16x32xf32> to vector<16x32xf32>
      %c2 = arith.constant 2 : index
      %c0_48 = arith.constant 0 : index
      %c0_49 = arith.constant 0 : index
      %55 = vector.load %arg6[%c2, %c0_48, %c0_49] : memref<3x32x32xf32, #tpu.memory_space<vmem>>, vector<1x32x32xf32>
      %56 = vector.shape_cast %55 : vector<1x32x32xf32> to vector<32x32xf32>
      %cst_50 = arith.constant dense<0.000000e+00> : vector<16x32xf32>
      %57 = tpu.matmul %54, %56, %cst_50 {dimension_numbers = #tpu.dot_dimension_numbers<[1], [0], [0], [1], [0, 0, 1, 1], [], []>} : vector<16x32xf32>, vector<32x32xf32>, vector<16x32xf32> -> vector<16x32xf32>
      %c2_51 = arith.constant 2 : index
      %c0_52 = arith.constant 0 : index
      %c0_53 = arith.constant 0 : index
      %58 = vector.load %arg7[%c2_51, %c0_52, %c0_53] : memref<3x1x32xf32, #tpu.memory_space<vmem>>, vector<1x1x32xf32>
      %59 = vector.shape_cast %58 : vector<1x1x32xf32> to vector<1x32xf32>
      %60 = vector.broadcast %59 : vector<1x32xf32> to vector<16x32xf32>
      %61 = arith.addf %57, %60 : vector<16x32xf32>
      %62 = vector.shape_cast %61 : vector<16x32xf32> to vector<1x16x32xf32>
      %63 = arith.index_cast %arg2 : i32 to index
      %c0_54 = arith.constant 0 : index
      %c0_55 = arith.constant 0 : index
      %c0_56 = arith.constant 0 : index
      %64 = vector.load %arg11[%63, %c0_54, %c0_55, %c0_56] : memref<2x1x16x32xf32, #tpu.memory_space<vmem>>, vector<1x1x16x32xf32>
      %65 = vector.shape_cast %64 : vector<1x1x16x32xf32> to vector<1x16x32xf32>
      %66 = vector.shape_cast %62 : vector<1x16x32xf32> to vector<1x1x16x32xf32>
      tpu.vector_store %arg11[%63, %c0_54, %c0_55, %c0_56], %66 {strides = array<i32>} : memref<2x1x16x32xf32, #tpu.memory_space<vmem>>, vector<1x1x16x32xf32>,
    } else {
    }
    %c0_i32_1 = arith.constant 0 : i32
    %3 = arith.cmpi eq, %arg2, %c0_i32_1 : i32
    %4 = arith.extui %3 : i1 to i32
    %c0_i32_2 = arith.constant 0 : i32
    %5 = arith.cmpi ne, %4, %c0_i32_2 : i32
    scf.if %5 {
      %c0_33 = arith.constant 0 : index
      %c0_34 = arith.constant 0 : index
      %c0_35 = arith.constant 0 : index
      %39 = vector.load %arg3[%c0_33, %c0_34, %c0_35] : memref<1x16x32xf32, #tpu.memory_space<vmem>>, vector<1x16x32xf32>
      %40 = vector.shape_cast %39 : vector<1x16x32xf32> to vector<16x32xf32>
      %c0_36 = arith.constant 0 : index
      %c0_37 = arith.constant 0 : index
      %c0_38 = arith.constant 0 : index
      %41 = vector.load %arg6[%c0_36, %c0_37, %c0_38] : memref<3x32x32xf32, #tpu.memory_space<vmem>>, vector<1x32x32xf32>
      %42 = vector.shape_cast %41 : vector<1x32x32xf32> to vector<32x32xf32>
      %cst_39 = arith.constant dense<0.000000e+00> : vector<16x32xf32>
      %43 = tpu.matmul %40, %42, %cst_39 {dimension_numbers = #tpu.dot_dimension_numbers<[1], [0], [0], [1], [0, 0, 1, 1], [], []>} : vector<16x32xf32>, vector<32x32xf32>, vector<16x32xf32> -> vector<16x32xf32>
      %c0_40 = arith.constant 0 : index
      %c0_41 = arith.constant 0 : index
      %c0_42 = arith.constant 0 : index
      %44 = vector.load %arg7[%c0_40, %c0_41, %c0_42] : memref<3x1x32xf32, #tpu.memory_space<vmem>>, vector<1x1x32xf32>
      %45 = vector.shape_cast %44 : vector<1x1x32xf32> to vector<1x32xf32>
      %46 = vector.broadcast %45 : vector<1x32xf32> to vector<16x32xf32>
      %47 = arith.addf %43, %46 : vector<16x32xf32>
      %cst_43 = arith.constant 0.176776692 : f32
      %48 = vector.broadcast %cst_43 : f32 to vector<16x32xf32>
      %49 = arith.mulf %47, %48 : vector<16x32xf32>
      %50 = vector.shape_cast %49 : vector<16x32xf32> to vector<1x16x32xf32>
      %c0_44 = arith.constant 0 : index
      %c0_45 = arith.constant 0 : index
      %c0_46 = arith.constant 0 : index
      %51 = vector.load %arg9[%c0_44, %c0_45, %c0_46] : memref<1x16x32xf32, #tpu.memory_space<vmem>>, vector<1x16x32xf32>
      tpu.vector_store %arg9[%c0_44, %c0_45, %c0_46], %50 {strides = array<i32>} : memref<1x16x32xf32, #tpu.memory_space<vmem>>, vector<1x16x32xf32>,
      %cst_47 = arith.constant -1.000000e+30 : f32
      %52 = vector.broadcast %cst_47 : f32 to vector<1x16x1xf32>
      %c0_48 = arith.constant 0 : index
      %c0_49 = arith.constant 0 : index
      %c0_50 = arith.constant 0 : index
      %53 = vector.load %arg12[%c0_48, %c0_49, %c0_50] : memref<1x16x1xf32, #tpu.memory_space<vmem>>, vector<1x16x1xf32>
      tpu.vector_store %arg12[%c0_48, %c0_49, %c0_50], %52 {strides = array<i32>} : memref<1x16x1xf32, #tpu.memory_space<vmem>>, vector<1x16x1xf32>,
      %cst_51 = arith.constant 0.000000e+00 : f32
      %54 = vector.broadcast %cst_51 : f32 to vector<1x16x1xf32>
      %c0_52 = arith.constant 0 : index
      %c0_53 = arith.constant 0 : index
      %c0_54 = arith.constant 0 : index
      %55 = vector.load %arg13[%c0_52, %c0_53, %c0_54] : memref<1x16x1xf32, #tpu.memory_space<vmem>>, vector<1x16x1xf32>
      tpu.vector_store %arg13[%c0_52, %c0_53, %c0_54], %54 {strides = array<i32>} : memref<1x16x1xf32, #tpu.memory_space<vmem>>, vector<1x16x1xf32>,
      %cst_55 = arith.constant 0.000000e+00 : f32
      %56 = vector.broadcast %cst_55 : f32 to vector<1x16x32xf32>
      %c0_56 = arith.constant 0 : index
      %c0_57 = arith.constant 0 : index
      %c0_58 = arith.constant 0 : index
      %57 = vector.load %arg14[%c0_56, %c0_57, %c0_58] : memref<1x16x32xf32, #tpu.memory_space<vmem>>, vector<1x16x32xf32>
      tpu.vector_store %arg14[%c0_56, %c0_57, %c0_58], %56 {strides = array<i32>} : memref<1x16x32xf32, #tpu.memory_space<vmem>>, vector<1x16x32xf32>,
    } else {
    }
    %c0 = arith.constant 0 : index
    %c0_3 = arith.constant 0 : index
    %c0_4 = arith.constant 0 : index
    %6 = vector.load %arg9[%c0, %c0_3, %c0_4] : memref<1x16x32xf32, #tpu.memory_space<vmem>>, vector<1x16x32xf32>
    %7 = arith.index_cast %arg2 : i32 to index
    %c0_5 = arith.constant 0 : index
    %c0_6 = arith.constant 0 : index
    %c0_7 = arith.constant 0 : index
    %8 = vector.load %arg10[%7, %c0_5, %c0_6, %c0_7] : memref<2x1x16x32xf32, #tpu.memory_space<vmem>>, vector<1x1x16x32xf32>
    %9 = vector.shape_cast %8 : vector<1x1x16x32xf32> to vector<1x16x32xf32>
    %10 = arith.index_cast %arg2 : i32 to index
    %c0_8 = arith.constant 0 : index
    %c0_9 = arith.constant 0 : index
    %c0_10 = arith.constant 0 : index
    %11 = vector.load %arg11[%10, %c0_8, %c0_9, %c0_10] : memref<2x1x16x32xf32, #tpu.memory_space<vmem>>, vector<1x1x16x32xf32>
    %12 = vector.shape_cast %11 : vector<1x1x16x32xf32> to vector<1x16x32xf32>
    %cst = arith.constant dense<0.000000e+00> : vector<1x16x16xf32>
    %13 = tpu.matmul %6, %9, %cst {dimension_numbers = #tpu.dot_dimension_numbers<[2], [2], [1], [1], [0, 0, 0, 1, 1, 1], [0], [0]>} : vector<1x16x32xf32>, vector<1x16x32xf32>, vector<1x16x16xf32> -> vector<1x16x16xf32>
    %c0_11 = arith.constant 0 : index
    %c0_12 = arith.constant 0 : index
    %c0_13 = arith.constant 0 : index
    %14 = vector.load %arg12[%c0_11, %c0_12, %c0_13] : memref<1x16x1xf32, #tpu.memory_space<vmem>>, vector<1x16x1xf32>
    %cst_14 = arith.constant dense<0xFF800000> : vector<1x16xf32>
    %15 = vector.multi_reduction <maximumf>, %13, %cst_14 [2] : vector<1x16x16xf32> to vector<1x16xf32>
    %16 = vector.shape_cast %15 : vector<1x16xf32> to vector<1x16x1xf32>
    %17 = arith.maximumf %14, %16 : vector<1x16x1xf32>
    %18 = arith.subf %14, %17 : vector<1x16x1xf32>
    %19 = math.exp %18 : vector<1x16x1xf32>
    %20 = vector.broadcast %17 : vector<1x16x1xf32> to vector<1x16x16xf32>
    %21 = arith.subf %13, %20 : vector<1x16x16xf32>
    %22 = math.exp %21 : vector<1x16x16xf32>
    %c0_15 = arith.constant 0 : index
    %c0_16 = arith.constant 0 : index
    %c0_17 = arith.constant 0 : index
    %23 = vector.load %arg13[%c0_15, %c0_16, %c0_17] : memref<1x16x1xf32, #tpu.memory_space<vmem>>, vector<1x16x1xf32>
    %24 = arith.mulf %19, %23 : vector<1x16x1xf32>
    %cst_18 = arith.constant dense<0.000000e+00> : vector<1x16xf32>
    %25 = vector.multi_reduction <add>, %22, %cst_18 [2] : vector<1x16x16xf32> to vector<1x16xf32>
    %26 = vector.shape_cast %25 : vector<1x16xf32> to vector<1x16x1xf32>
    %27 = arith.addf %24, %26 : vector<1x16x1xf32>
    %c0_19 = arith.constant 0 : index
    %c0_20 = arith.constant 0 : index
    %c0_21 = arith.constant 0 : index
    %28 = vector.load %arg13[%c0_19, %c0_20, %c0_21] : memref<1x16x1xf32, #tpu.memory_space<vmem>>, vector<1x16x1xf32>
    tpu.vector_store %arg13[%c0_19, %c0_20, %c0_21], %27 {strides = array<i32>} : memref<1x16x1xf32, #tpu.memory_space<vmem>>, vector<1x16x1xf32>,
    %c0_22 = arith.constant 0 : index
    %c0_23 = arith.constant 0 : index
    %c0_24 = arith.constant 0 : index
    %29 = vector.load %arg14[%c0_22, %c0_23, %c0_24] : memref<1x16x32xf32, #tpu.memory_space<vmem>>, vector<1x16x32xf32>
    %30 = vector.broadcast %19 : vector<1x16x1xf32> to vector<1x16x32xf32>
    %31 = arith.mulf %30, %29 : vector<1x16x32xf32>
    %cst_25 = arith.constant dense<0.000000e+00> : vector<1x16x32xf32>
    %32 = tpu.matmul %22, %12, %cst_25 {dimension_numbers = #tpu.dot_dimension_numbers<[2], [1], [1], [2], [0, 0, 0, 1, 1, 2], [0], [0]>} : vector<1x16x16xf32>, vector<1x16x32xf32>, vector<1x16x32xf32> -> vector<1x16x32xf32>
    %33 = arith.addf %31, %32 : vector<1x16x32xf32>
    %c0_26 = arith.constant 0 : index
    %c0_27 = arith.constant 0 : index
    %c0_28 = arith.constant 0 : index
    %34 = vector.load %arg14[%c0_26, %c0_27, %c0_28] : memref<1x16x32xf32, #tpu.memory_space<vmem>>, vector<1x16x32xf32>
    tpu.vector_store %arg14[%c0_26, %c0_27, %c0_28], %33 {strides = array<i32>} : memref<1x16x32xf32, #tpu.memory_space<vmem>>, vector<1x16x32xf32>,
    %c0_29 = arith.constant 0 : index
    %c0_30 = arith.constant 0 : index
    %c0_31 = arith.constant 0 : index
    %35 = vector.load %arg12[%c0_29, %c0_30, %c0_31] : memref<1x16x1xf32, #tpu.memory_space<vmem>>, vector<1x16x1xf32>
    tpu.vector_store %arg12[%c0_29, %c0_30, %c0_31], %17 {strides = array<i32>} : memref<1x16x1xf32, #tpu.memory_space<vmem>>, vector<1x16x1xf32>,
    %c1_i32 = arith.constant 1 : i32
    %36 = arith.cmpi eq, %arg2, %c1_i32 : i32
    %37 = arith.extui %36 : i1 to i32
    %c0_i32_32 = arith.constant 0 : i32
    %38 = arith.cmpi ne, %37, %c0_i32_32 : i32
    scf.if %38 {
      %c0_33 = arith.constant 0 : index
      %c0_34 = arith.constant 0 : index
      %c0_35 = arith.constant 0 : index
      %39 = vector.load %arg14[%c0_33, %c0_34, %c0_35] : memref<1x16x32xf32, #tpu.memory_space<vmem>>, vector<1x16x32xf32>
      %c0_36 = arith.constant 0 : index
      %c0_37 = arith.constant 0 : index
      %c0_38 = arith.constant 0 : index
      %40 = vector.load %arg13[%c0_36, %c0_37, %c0_38] : memref<1x16x1xf32, #tpu.memory_space<vmem>>, vector<1x16x1xf32>
      %41 = vector.broadcast %40 : vector<1x16x1xf32> to vector<1x16x32xf32>
      %42 = arith.divf %39, %41 : vector<1x16x32xf32>
      %c0_39 = arith.constant 0 : index
      %c0_40 = arith.constant 0 : index
      %c0_41 = arith.constant 0 : index
      %43 = vector.load %arg8[%c0_39, %c0_40, %c0_41] : memref<1x16x32xf32, #tpu.memory_space<vmem>>, vector<1x16x32xf32>
      tpu.vector_store %arg8[%c0_39, %c0_40, %c0_41], %42 {strides = array<i32>} : memref<1x16x32xf32, #tpu.memory_space<vmem>>, vector<1x16x32xf32>,
    } else {
    }
    return
  }
  func.func @transform_0(%arg0: i32, %arg1: i32, %arg2: i32) -> (i32, i32, i32) {
    %c0_i32 = arith.constant 0 : i32
    %c0_i32_0 = arith.constant 0 : i32
    return %arg0, %arg1, %c0_i32 : i32, i32, i32
  }
  func.func @transform_1(%arg0: i32, %arg1: i32, %arg2: i32) -> (i32, i32, i32) {
    %c0_i32 = arith.constant 0 : i32
    %0 = arith.cmpi eq, %arg1, %c0_i32 : i32
    %c0_i32_0 = arith.constant 0 : i32
    %1 = arith.select %0, %arg2, %c0_i32_0 : i32
    %c0_i32_1 = arith.constant 0 : i32
    %c0_i32_2 = arith.constant 0 : i32
    return %arg0, %1, %c0_i32_1 : i32, i32, i32
  }
  func.func @transform_2(%arg0: i32, %arg1: i32, %arg2: i32) -> (i32, i32, i32) {
    %c0_i32 = arith.constant 0 : i32
    %0 = arith.cmpi eq, %arg1, %c0_i32 : i32
    %c0_i32_0 = arith.constant 0 : i32
    %1 = arith.select %0, %arg2, %c0_i32_0 : i32
    %c0_i32_1 = arith.constant 0 : i32
    %c0_i32_2 = arith.constant 0 : i32
    return %arg0, %1, %c0_i32_1 : i32, i32, i32
  }
  func.func @transform_3(%arg0: i32, %arg1: i32, %arg2: i32) -> (i32, i32, i32) {
    %c0_i32 = arith.constant 0 : i32
    %c0_i32_0 = arith.constant 0 : i32
    %c0_i32_1 = arith.constant 0 : i32
    %c0_i32_2 = arith.constant 0 : i32
    return %c0_i32, %c0_i32_0, %c0_i32_1 : i32, i32, i32
  }
  func.func @transform_4(%arg0: i32, %arg1: i32, %arg2: i32) -> (i32, i32, i32) {
    %c0_i32 = arith.constant 0 : i32
    %c0_i32_0 = arith.constant 0 : i32
    %c0_i32_1 = arith.constant 0 : i32
    %c0_i32_2 = arith.constant 0 : i32
    return %c0_i32, %c0_i32_0, %c0_i32_1 : i32, i32, i32
  }
  func.func @transform_5(%arg0: i32, %arg1: i32, %arg2: i32) -> (i32, i32, i32) {
    %c0_i32 = arith.constant 0 : i32
    %c0_i32_0 = arith.constant 0 : i32
    return %arg0, %arg1, %c0_i32 : i32, i32, i32
  }
}

</mosaic_0001>

<bundles_post_ra>
// kernel: tpu_custom_call.1
= control target key start
LH: loop header
LB: loop body
LE: loop exit
PB: predicated region body
PF: predicated region fallthrough
CT: control target
= control target key end

     0   :  { %s1827_s0 = inlined_call_operand.hbm [shape: f32[2,32,32], index: 0, kind: input, shape index: {}]   ;;  %s1828_s1 = inlined_call_operand.hbm [shape: f32[2,32,32], index: 1, kind: input, shape index: {}]   ;;  %s1829_s2 = inlined_call_operand.hbm [shape: f32[2,32,32], index: 2, kind: input, shape index: {}]   ;;  %s1830_s3 = inlined_call_operand.hbm [shape: f32[3,32,32], index: 3, kind: input, shape index: {}]   ;;  %s1831_s4 = inlined_call_operand.vmem [shape: f32[3,1,32], index: 4, kind: input, shape index: {}]   ;;  %s1832_s5 = inlined_call_operand.hbm [shape: f32[2,32,32], index: 5, kind: output, shape index: {}]  }
   0x1   :  { %1848 = sst [smem:[#allocation33_spill]] %s1828_s1 }
   0x2   :  { %1849 = sst [smem:[#allocation34_spill]] %s1829_s2 }
   0x3   :  { %1850 = sst [smem:[#allocation35_spill]] %s1830_s3 }
   0x4   :  { %1851 = sst [smem:[#allocation36_spill]] %s1831_s4 }
   0x5   :  { %1852 = sst [smem:[#allocation37_spill]] %s1832_s5 }
   0x6   :  { %10 = vsyncpa [#allocation9], 0 }
   0x7   :  { %12 = vsyncpa [#allocation9 + $0x1], 0 }
   0x8   :  { %13 = vsyncpa [#allocation12], 0 }
   0x9   :  { %15 = vsyncpa [#allocation12 + $0x1], 0 }
   0xa   :  { %16 = vsyncpa [#allocation15], 0 }
   0xb   :  { %17 = vsyncpa [#allocation10], 0 }
   0xc   :  { %19 = vsyncpa [#allocation10 + $0x1], 0  ;;  %s1455_s18 = smov 0   ;;  %s1457_s19 = smov 0  }
   0xd   :  { %s1459_s20 = smov 0   ;;  %s1461_s21 = smov 0  }
   0xe   :  { %s1463_s22 = smov 0   ;;  %s1465_s23 = smov 0  }
   0xf   :  { %s1467_s24 = smov 0   ;;  %s1469_s25 = smov 0  }
  0x10   :  { %s1471_s26 = smov 0   ;;  %s1473_s27 = smov 0  }
  0x11   :  { %s1475_s28 = smov 0   ;;  %s1477_s29 = smov 0  }
  0x12   :  { %s1479_s30 = smov 0  }
  0x13 LB: > { %1853 = sst [smem:[#allocation21_spill]] %s1374_s20  ;;  %s37_s6 = sadd.s32 1, %s1402_s27  ;;  %s1414_s30 = sphi %s1479_s30, %s25_s30   ;;  %s1410_s29 = sphi %s1477_s29, %s1905_s29   ;;  %s1406_s28 = sphi %s1475_s28, %s1904_s28   ;;  %s1402_s27 = sphi %s1473_s27, %s1895_s27   ;;  %s1398_s26 = sphi %s1471_s26, %s1903_s26   ;;  %s1394_s25 = sphi %s1469_s25, %s1902_s25   ;;  %s1390_s24 = sphi %s1467_s24, %s1894_s24   ;;  %s1386_s23 = sphi %s1465_s23, %s1893_s23   ;;  %s1382_s22 = sphi %s1463_s22, %s1901_s22   ;;  %s1378_s21 = sphi %s1461_s21, %s1900_s21   ;;  %s1374_s20 = sphi %s1459_s20, %s1891_s20   ;;  %s1370_s19 = sphi %s1457_s19, %s1899_s19   ;;  %s1366_s18 = sphi %s1455_s18, %s1898_s18  }
  0x14   : > { %1854 = sst [smem:[#allocation22_spill]] %s1386_s23  ;;  %p38_p0 = scmp.ge.s32.totalorder %s37_s6, 2 }
  0x15   : > { %1855 = sst [smem:[#allocation23_spill]] %s1390_s24  ;;  %s40_s7 = sadd.s32 1, %s1406_s28 }
  0x16   : > { %1856 = sst [smem:[#allocation24_spill]] %s1394_s25  ;;  %s44_s8 = sadd.s32 1, %s1410_s29 }
  0x17   : > { %1857 = sst [smem:[#allocation25_spill]] %s1398_s26  ;;  %p76_p1 = scmp.eq.s32.totalorder %s1406_s28, 0 }
  0x18   : > { %1858 = sst [smem:[#allocation26_spill]] %s1402_s27  ;;  %s1907_s6 = smov (%p38_p0, %s37_s6), 0 }
  0x19   : > { %1859 = sst [smem:[#allocation27_spill]] %s1907_s6  ;;  %s1909_s7 = smov (!%p38_p0, %s40_s7), %s1406_s28 }
  0x1a   : > { %s77_s9 = scalar_select %p76_p1, %s1402_s27, 0 }
  0x1b   : > { %p42_p2 = scmp.ge.s32.totalorder %s1909_s7, 2  ;;  %p61_p3 = scmp.eq.s32.totalorder %s1414_s30, 0 }
  0x1c   : > { %s85_s10 = sadd.s32 1, %s1374_s20  ;;  %p92_p4 = scmp.ne.s32.totalorder %s1374_s20, %s1370_s19 }
  0x1d   : > { %s1911_s7 = smov (%p42_p2, %s1909_s7), 0  ;;  %s1913_s8 = smov (!%p42_p2, %s44_s8), %s1410_s29 }
  0x1e   : > { %1860 = sst [smem:[#allocation28_spill]] %s1911_s7  ;;  %p78_p5 = scmp.eq.s32.totalorder %s1911_s7, 0 }
  0x1f   : > { %p98_p6 = scmp.ne.s32.totalorder %s1370_s19, %s1366_s18  ;;  %p46_p7 = scmp.ge.s32.totalorder %s1913_s8, 2 }
  0x20   : > { %s49_s11 = ssub.s32 %s1406_s28, %s1911_s7  ;;  %p1545_p8 = por %p92_p4, %p61_p3 }
  0x21   : > { %s79_s12 = scalar_select %p78_p5, %s1907_s6, 0 }
  0x22   : > { %s1915_s8 = smov (%p46_p7, %s1913_s8), 0  ;;  %p1840_p10 = scmp.lt.s32.totalorder %s1414_s30, 8 }
  0x23   : > { %1861 = sst [smem:[#allocation29_spill]] %s1915_s8  ;;  %s81_s13 = ssub.s32 %s77_s9, %s79_s12 }
  0x24   : > { %s48_s15 = ssub.s32 %s1410_s29, %s1915_s8  ;;  %s925_s6 = sshll.u32 %s1410_s29, 2 }
  0x25   : > { %s82_s16 = sor.u32 %s81_s13, %s48_s15  ;;  %s1551_s17 = sor.u32 %s49_s11, %s48_s15 }
  0x26   : > { %p83_p9 = scmp.eq.s32.totalorder %s82_s16, 0  ;;  %s265_s27 = sand.u32 1, %s1414_s30  }
  0x27   : > { %s267_s5 = sand.u32 1, %s1374_s20   ;;  %s928_s12 = sshll.u32 %s77_s9, 1 }
  0x28   : > { %s1555_s7 = scalar_select %p83_p9, %s1374_s20, %s85_s10  }
  0x29   : > { %s927_s26 = sshll.u32 %s267_s5, 4  ;;  %s276_s4 = sadd.s32 %s928_s12, %s925_s6 }
  0x2a   : > { %1863 = sst [smem:[#allocation30_spill]] %s1555_s7  ;;  %s930_s24 = sshll.u32 %s276_s4, 3 }
  0x2b   : > { %s269_s25 = scalar_lea.vmem [#allocation11], %s927_s26  ;;  %s1864_s1 = sld [smem:[#allocation33_spill]] }
  0x2c   : > { %s281_s8 = sshll.u32 %s269_s25, 4  ;;  %p1569_p11 = pnand %p1840_p10, %p1545_p8  ;;  %s282_s8 = int_to_ptr.vmem [resolvable:$true] %s281_s8 }
  0x2d   : > { %s1866_s2 = sld [smem:[#allocation34_spill]]  ;;  %s1576_s9 = scalar_lea.sflag [#allocation12], %s265_s27 }
  0x2e   : > { %s1841_s12 = smov 128   ;;  %s1843_s13 = smov 8  }
  0x2f   : > { %p51_p12 = scmp.eq.s32.totalorder %s1551_s17, 0  ;;  %s295_s11 = scalar_lea.vmem [#allocation13], %s927_s26 }
  0x30   : > { %s1590_s4 = sadd.s32 4294967295, %s1414_s30   ;;  %p920_p13 = scmp.ge.s32.totalorder %s1414_s30, 1 }
  0x31   : > { %s278_s15 = scalar_lea.hbm %s1864_s1, %s930_s24  ;;  %p67_p0 = scmp.eq.s32.totalorder %s1590_s4, 0 }
  0x32   : > { %s279_s10 = sshll.u32 %s278_s15, 4  ;;  %s1587_s15 = sshll.u32 %s295_s11, 4  ;;  %s280_s10 = int_to_ptr.hbm [resolvable:$true] %s279_s10  ;;  %s308_s15 = int_to_ptr.vmem [resolvable:$true] %s1587_s15 }
  0x33   : > { %s304_s25 = scalar_lea.hbm %s1866_s2, %s930_s24  ;;  %p198_p1 = scmp.eq.s32.totalorder %s1590_s4, 7 }
  0x34   : > { %1004 = dma.hbm_to_vmem [thread:$0]  (!%p1569_p11), %s280_s10, 256, %s282_s8, %s1576_s9, %s1841_s12, %s1841_s12, %s1843_s13  }
  0x35   : > { %s305_s14 = sshll.u32 %s304_s25, 4  ;;  %p211_p2 = scmp.lt.s32.totalorder %s1414_s30, 9  ;;  %s1585_s14 = int_to_ptr.hbm [resolvable:$true] %s305_s14 }
  0x36   : > { %p1601_p4 = por %p98_p6, %p67_p0  ;;  %s1868_s3 = sld [smem:[#allocation35_spill]] }
  0x37   : > { %p1608_p5 = pnand %p920_p13, %p211_p2  ;;  %s1418_s18 = smov [#allocation14]  }
  0x38   : > { %s224_s5 = sshll.u32 %s1418_s18, 4  ;;  %s919_s25 = sadd.s32 4294967294, %s1414_s30   ;;  %s225_s5 = int_to_ptr.vmem [resolvable:$true] %s224_s5 }
  0x39   : > { %p994_p7 = pneg %p1608_p5  ;;  %s53_s11 = sadd.s32 1, %s1386_s23 }
  0x3a   : > { %s1624_s26 = scalar_select %p51_p12, %s1386_s23, %s53_s11  }
  0x3b   : > { %p995_p6 = pnand %p994_p7, %p67_p0  ;;  %p60_p8 = scmp.ne.s32.totalorder %s1386_s23, %s1382_s22 }
  0x3c   : > { %s222_s8 = sshll.u32 %s1868_s3, 4  ;;  %1870 = sst [smem:[#allocation31_spill]] %s1624_s26  ;;  %s223_s8 = int_to_ptr.hbm [resolvable:$true] %s222_s8 }
  0x3d   : > { %997 = dma.hbm_to_vmem [thread:$0]  (!%p995_p6), %s223_s8, 1536, %s225_s5, [#allocation15], %s1841_s12, %s1841_s12, %s1843_s13  }
  0x3e   : > { %p66_p9 = scmp.ne.s32.totalorder %s1382_s22, %s1378_s21  ;;  %p204_p13 = scmp.eq.s32.totalorder %s919_s25, 7 }
  0x3f   : > { %s241_s27 = sand.u32 1, %s1386_s23   ;;  %p62_p2 = por %p61_p3, %p60_p8 }
  0x40   : > { %p1635_p10 = por %p67_p0, %p66_p9  ;;  %p1641_p7 = por %p198_p1, %p60_p8 }
  0x41   : > { %p1645_p12 = por %p204_p13, %p66_p9  ;;  %s923_s5 = sshll.u32 %s241_s27, 4 }
  0x42   : > { %s924_s25 = sshll.u32 %s1406_s28, 1  ;;  %s245_s12 = scalar_lea.vmem [#allocation8], %s923_s5 }
  0x43   : > { %s1873_s17 = scalar_select %p1645_p12, 1, 0 }
  0x44   : > { %s250_s11 = sadd.s32 %s925_s6, %s924_s25  ;;  %s255_s13 = sshll.u32 %s245_s12, 4  ;;  %s256_s13 = int_to_ptr.vmem [resolvable:$true] %s255_s13 }
  0x45   : > { %1874 = sst [smem:[#allocation32_spill]] %s1873_s17  ;;  %s926_s1 = sshll.u32 %s250_s11, 3 }
  0x46   : > { %s252_s26 = scalar_lea.hbm %s1827_s0, %s926_s1  ;;  %p1875_p3 = scmp.lt.s32.totalorder %s1414_s30, 8 }
  0x47   : > { %s253_s23 = sshll.u32 %s252_s26, 4  ;;  %s242_s7 = scalar_lea.sflag [#allocation9], %s241_s27  ;;  %s254_s23 = int_to_ptr.hbm [resolvable:$true] %s253_s23 }
  0x48   : > { %p999_p1 = pnand %p1875_p3, %p62_p2  ;;  %s1876_s20 = smov 8  }
  0x49   : > { %s1877_s17 = smov 128   ;;  %319 = sbr.rel (%p1608_p5) target bundleno = 1096 (0x448), region = 40 }
  0x4a   : > { %1001 = dma.hbm_to_vmem [thread:$0]  (!%p999_p1), %s254_s23, 256, %s256_s13, %s242_s7, %s1877_s17, %s1877_s17, %s1876_s20  }
  0x4b   : > { %1007 = dma.hbm_to_vmem [thread:$0]  (!%p1569_p11), %s1585_s14, 256, %s308_s15, %s1576_s9, %s1877_s17, %s1877_s17, %s1876_s20  }
  0x4c   : > { %s1671_s1 = sand.u32 (!%p1608_p5), 1, %s1382_s22  }
  0x4d   : > { %s936_s2 = sshll.u32 (!%p1608_p5), %s1671_s1, 4  ;;  %s322_s3 = scalar_lea.sflag (!%p1608_p5), [#allocation9], %s1671_s1 }
  0x4e   : > { %s1675_s6 = scalar_lea.vmem [#allocation8], %s936_s2 }
  0x4f   : > { %1349 = dma.done.wait (%p1635_p10), %s322_s3, 256  }
  0x50   : > { %1351 = vsyncadd (%p1635_p10), %s322_s3, 4294967040  ;;  %s331_s20 = sand.u32 1, %s1590_s4   ;;  %s333_s23 = sand.u32 1, %s1370_s19  }
  0x51   : > { %s1683_s7 = sshll.u32 %s333_s23, 4  ;;  %s332_s16 = scalar_lea.sflag [#allocation12], %s331_s20 }
  0x52   : > { %s335_s9 = scalar_lea.vmem [#allocation11], %s1683_s7 }
  0x53   : > { %1353 = dma.done.wait (%p1601_p4), %s332_s16, 512  }
  0x54   : > { %1355 = vsyncadd (%p1601_p4), %s332_s16, 4294966784  ;;  %s345_s12 = scalar_lea.vmem [#allocation13], %s1683_s7 }
  0x55   : > { %1357 = dma.done.wait (%p67_p0), [#allocation15], 1536  }
  0x56   : > { %1359 = vsyncadd (%p67_p0), [#allocation15], 4294965760  ;;  %s1695_s13 = scalar_lea.vmem [#allocation16], %s936_s2  ;;  %s1878_s14 = sld [smem:[#allocation24_spill]] }
  0x5c   : > { %p941_p10 = scmp.ne.s32.totalorder %s1878_s14, 0 }
  0x5d   : > { %s1879_s15 = sld [smem:[#allocation23_spill]] (!%p941_p10) }
  0x5e   : > { %399 = sbr.rel (%p941_p10) target bundleno = 243 (0xf3), region = 60  ;;  %s1880_s10 = sld [smem:[#allocation36_spill]] (!%p941_p10) }
  0x63   : > { %v406_v0 = vld [vmem:[#allocation14 + $0x38] sm:$0xff]  ;;  %v405_v2 = vld [vmem:[#allocation14 + $0x30] sm:$0xff]  ;;  %v404_v4 = vld [vmem:[#allocation14 + $0x28] sm:$0xff]  ;;  %vm412_vm0 = vcmask 261120   ;;  %s945_s26 = sshll.u32 %s1879_s15, 4 }
  0x64   : > { %v452_v1 = vld [vmem:[#allocation14 + $0x58] sm:$0xff]  ;;  %966 = vmatpush.msra.mxu2 %v406_v0  ;;  %v451_v3 = vld [vmem:[#allocation14 + $0x50] sm:$0xff]  ;;  %v450_v5 = vld [vmem:[#allocation14 + $0x48] sm:$0xff]  ;;  %431 = vmatpush.msra.mxu0 %v406_v0  ;;  %s443_s17 = scalar_lea.vmem [#allocation3], %s945_s26  ;;  %s487_s5 = scalar_lea.vmem [#allocation4], %s945_s26 }
  0x65   : > { %970 = vmatpush.msra.mxu3 %v452_v1  ;;  %476 = vmatpush.msra.mxu1 %v452_v1  ;;  %v403_v6 = vld [vmem:[#allocation14 + $0x20] sm:$0xff]  ;;  %v401_v8 = vld [vmem:[%s335_s9 + $0x8] sm:$0xff] }
  0x66   : > { %967 = vmatpush.msra.mxu2 %v405_v2  ;;  %v449_v7 = vld [vmem:[#allocation14 + $0x40] sm:$0xff]  ;;  %432 = vmatpush.msra.mxu0 %v405_v2  ;;  %v447_v9 = vld [vmem:[%s345_s12 + $0x8] sm:$0xff] }
  0x67   : > { %971 = vmatpush.msra.mxu3 %v451_v3  ;;  %477 = vmatpush.msra.mxu1 %v451_v3  ;;  %v400_v10 = vld [vmem:[%s335_s9] sm:$0xff] }
  0x68   : > { %968 = vmatpush.msra.mxu2 %v404_v4  ;;  %433 = vmatpush.msra.mxu0 %v404_v4  ;;  %v446_v11 = vld [vmem:[%s345_s12] sm:$0xff] }
  0x69   : > { %972 = vmatpush.msra.mxu3 %v450_v5  ;;  %478 = vmatpush.msra.mxu1 %v450_v5  ;;  %v1129_v12 = vld [vmem:[%s1880_s10 + $0x1] ss:$0 sm:$0xff]  ;;  %v1130_v13 = vld [vmem:[%s1880_s10 + $0x2] ss:$0 sm:$0xff] }
  0x6a   : > { %969 = vmatpush.msra.mxu2 %v403_v6  ;;  %434 = vmatpush.msra.mxu0 %v403_v6 }
  0x6b   : > { %973 = vmatpush.msra.mxu3 %v449_v7  ;;  %944 = vmatmul.msk.f32.vlgmr.msra.gmra.mxu2 %vm412_vm0, %v401_v8 }
  0x6c   : > { %948 = vmatmul.msk.f32.vlgmr.msra.gmra.mxu3 %vm412_vm0, %v447_v9  ;;  %479 = vmatpush.msra.mxu1 %v449_v7 }
  0x6d   : > { %943 = vmatmul.msk.f32.vlgmr.msra.gmra.mxu0 %vm412_vm0, %v400_v10  ;;  %947 = vmatmul.msk.f32.vlgmr.msra.gmra.mxu1 %vm412_vm0, %v446_v11 }
  0xea   : > { %v436_v14 = vpop.f32.mrf.mxu0  ;;  %v481_v15 = vpop.f32.mrf.mxu1 }
  0xeb   : > { %v437_v16 = vadd.f32 %v1129_v12, %v436_v14  ;;  %v482_v17 = vadd.f32 %v1130_v13, %v481_v15 }
  0xed   : > { %444 = vst.msk [vmem:[%s443_s17] sm:$0xff] %vm412_vm0, %v437_v16 }
  0xee   : > { %v439_v18 = vpop.f32.mrf.mxu2  ;;  %488 = vst.msk [vmem:[%s487_s5] sm:$0xff] %vm412_vm0, %v482_v17 }
  0xef   : > { %v484_v19 = vpop.f32.mrf.mxu3  ;;  %v440_v20 = vadd.f32 %v1129_v12, %v439_v18 }
  0xf0   : > { %v485_v21 = vadd.f32 %v1130_v13, %v484_v19 }
  0xf1   : > { %445 = vst.msk [vmem:[%s443_s17 + $0x8] sm:$0xff] %vm412_vm0, %v440_v20 }
  0xf2   : > { %489 = vst.msk [vmem:[%s487_s5 + $0x8] sm:$0xff] %vm412_vm0, %v485_v21 }
  0xf3 PF: > { %s1881_s25 = sld [smem:[#allocation23_spill]] }
  0xf9   : > { %p949_p11 = scmp.ne.s32.totalorder %s1881_s25, 0 }
  0xfa   : > { %s1882_s3 = sld [smem:[#allocation36_spill]] (!%p949_p11) }
  0xfb   : > { %493 = sbr.rel (%p949_p11) target bundleno = 396 (0x18c), region = 64 }
 0x100   : > { %v499_v22 = vld [vmem:[#allocation14 + $0x18] sm:$0xff]  ;;  %v498_v23 = vld [vmem:[#allocation14 + $0x10] sm:$0xff]  ;;  %vm538_vm1 = vcmask 7168   ;;  %v1419_v24 = vmov 0.0   ;;  %v497_v25 = vld [vmem:[#allocation14 + $0x8] sm:$0xff]  ;;  %vm504_vm2 = vcmask 261120  }
 0x101   : > { %523 = vmatpush.msra.mxu0 %v499_v22  ;;  %974 = vmatpush.msra.mxu1 %v499_v22  ;;  %541 = vst.msk [vmem:[#allocation6] sm:$0xff] %vm538_vm1, %v1419_v24  ;;  %v1420_v26 = vmov -1e+30   ;;  %v496_v27 = vld [vmem:[#allocation14] sm:$0xff]  ;;  %v495_v29 = vld [vmem:[%s1675_s6 + $0x8] sm:$0xff] }
 0x102   : > { %539 = vst.msk [vmem:[#allocation5] sm:$0xff] %vm538_vm1, %v1420_v26  ;;  %v494_v28 = vld [vmem:[%s1675_s6] sm:$0xff] }
 0x103   : > { %524 = vmatpush.msra.mxu0 %v498_v23  ;;  %975 = vmatpush.msra.mxu1 %v498_v23  ;;  %540 = vst.msk [vmem:[#allocation5 + $0x8] sm:$0xff] %vm538_vm1, %v1420_v26  ;;  %v1131_v30 = vld [vmem:[%s1882_s3] ss:$0 sm:$0xff] }
 0x104   : > { %542 = vst.msk [vmem:[#allocation6 + $0x8] sm:$0xff] %vm538_vm1, %v1419_v24 }
 0x105   : > { %525 = vmatpush.msra.mxu0 %v497_v25  ;;  %976 = vmatpush.msra.mxu1 %v497_v25  ;;  %543 = vst.msk [vmem:[#allocation7] sm:$0xff] %vm504_vm2, %v1419_v24 }
 0x106   : > { %544 = vst.msk [vmem:[#allocation7 + $0x8] sm:$0xff] %vm504_vm2, %v1419_v24 }
 0x107   : > { %526 = vmatpush.msra.mxu0 %v496_v27  ;;  %977 = vmatpush.msra.mxu1 %v496_v27 }
 0x108   : > { %950 = vmatmul.msk.f32.vlgmr.msra.gmra.mxu0 %vm504_vm2, %v494_v28  ;;  %951 = vmatmul.msk.f32.vlgmr.msra.gmra.mxu1 %vm504_vm2, %v495_v29 }
 0x185   : > { %v528_v31 = vpop.f32.mrf.mxu0  ;;  %v531_v32 = vpop.f32.mrf.mxu1 }
 0x186   : > { %v529_v33 = vadd.f32 %v1131_v30, %v528_v31  ;;  %v532_v34 = vadd.f32 %v1131_v30, %v531_v32 }
 0x188   : > { %v534_v35 = vmul.f32 0.17677669, %v529_v33  ;;  %v535_v36 = vmul.f32 0.17677669, %v532_v34 }
 0x18a   : > { %536 = vst.msk [vmem:[#allocation2] sm:$0xff] %vm504_vm2, %v534_v35 }
 0x18b   : > { %537 = vst.msk [vmem:[#allocation2 + $0x8] sm:$0xff] %vm504_vm2, %v535_v36 }
 0x18c PF: > { %s1883_s6 = sld [smem:[#allocation23_spill]]  ;;  %vm554_vm3 = vcmask 261120   ;;  %vm592_vm4 = vcmask 130048   ;;  %v1421_v45 = vmov 0   ;;  %v591_v46 = vld [vmem:[#allocation5 + $0x8] sm:$0xff]  ;;  %vm635_vm5 = vcmask 7168  }
 0x18d   : > { %1132 = vset.pattern.permute.xlu1 %v1421_v45  ;;  %1133 = vset.pattern.permute.xlu2 %v1421_v45  ;;  %v590_v49 = vld [vmem:[#allocation5] sm:$0xff]  ;;  %v624_v6 = vld [vmem:[#allocation6 + $0x8] sm:$0xff]  ;;  %v623_v11 = vld [vmem:[#allocation6] sm:$0xff] }
 0x18e   : > { %1134 = vset.pattern.permute.xlu0 %v1421_v45  ;;  %v639_v15 = vld [vmem:[#allocation7 + $0x8] sm:$0xff]  ;;  %v638_v17 = vld [vmem:[#allocation7] sm:$0xff] }
 0x191   : > { %v545_v40 = vld [vmem:[#allocation2] sm:$0xff] }
 0x192   : > { %s952_s20 = sshll.u32 %s1883_s6, 4  ;;  %v546_v39 = vld [vmem:[#allocation2 + $0x8] sm:$0xff]  ;;  %p959_p0 = scmp.ne.s32.totalorder %s1883_s6, 1 }
 0x193   : > { %s548_s23 = scalar_lea.vmem [#allocation3], %s952_s20  ;;  %s551_s7 = scalar_lea.vmem [#allocation4], %s952_s20 }
 0x194   : > { %v550_v37 = vld [vmem:[%s548_s23 + $0x8] sm:$0xff]  ;;  %v549_v38 = vld [vmem:[%s548_s23] sm:$0xff] }
 0x195   : > { %978 = vmatpush.xpose.msk.msra.mxu2 %vm554_vm3, %v550_v37  ;;  %953 = vmatpush.xpose.msk.msra.mxu0 %vm554_vm3, %v550_v37  ;;  %v553_v58 = vld [vmem:[%s551_s7 + $0x8] sm:$0xff]  ;;  %v552_v59 = vld [vmem:[%s551_s7] sm:$0xff] }
 0x196   : > { %980 = vmatpush.msra.mxu3 %v553_v58  ;;  %672 = vmatpush.msra.mxu1 %v553_v58 }
 0x198   : > { %981 = vmatpush.msra.mxu3 %v552_v59  ;;  %673 = vmatpush.msra.mxu1 %v552_v59 }
 0x199   : > { %979 = vmatpush.xpose.msk.msra.mxu2 %vm554_vm3, %v549_v38  ;;  %954 = vmatpush.xpose.msk.msra.mxu0 %vm554_vm3, %v549_v38 }
 0x19c   : > { %956 = vmatmul.msk.f32.vlgmr.msra.gmra.mxu2 %vm554_vm3, %v546_v39  ;;  %955 = vmatmul.msk.f32.vlgmr.msra.gmra.mxu0 %vm554_vm3, %v545_v40 }
 0x219   : > { %v584_v43 = vpop.f32.mrf.mxu0 }
 0x21a   : > { %v593_v44 = vsel %vm592_vm4, %v584_v43, -inf }
 0x21f   : > { %v587_v41 = vpop.f32.mrf.mxu2 }
 0x220   : > { %v596_v42 = vsel %vm592_vm4, %v587_v41, -inf }
 0x221   : > { %597 = vmax.xlane.f32.xlu0 %v596_v42 }
 0x229   : > { %594 = vmax.xlane.f32.xlu0 %v593_v44 }
 0x294   : > { %v598_v47 = vpop.xlane.xlu0 %597 }
 0x295   : > { %v600_v48 = vmax.f32 %v591_v46, %v598_v47 }
 0x297   : > { %686 = vst.msk [vmem:[#allocation5 + $0x8] sm:$0xff] %vm635_vm5, %v600_v48  ;;  %614 = vperm.xlu1 %1132, %v600_v48   ;;  %v602_v54 = vsub.f32 %v591_v46, %v600_v48 }
 0x299   : > { %v605_v55 = vmul.f32 1.442695, %v602_v54 }
 0x29c   : > { %v595_v50 = vpop.xlane.xlu0 %594 }
 0x29d   : > { %v599_v51 = vmax.f32 %v590_v49, %v595_v50 }
 0x29f   : > { %v601_v52 = vsub.f32 %v590_v49, %v599_v51  ;;  %685 = vst.msk [vmem:[#allocation5] sm:$0xff] %vm635_vm5, %v599_v51  ;;  %609 = vperm.xlu1 %1132, %v599_v51  }
 0x2a1   : > { %v603_v53 = vmul.f32 1.442695, %v601_v52 }
 0x2a3   : > { %1135 = vpow2.f32 %v603_v53 }
 0x2a4   : > { %1137 = vpow2.f32 %v605_v55 }
 0x2a9   : > { %v1136_v56 = vpop.eup %1135 }
 0x2aa   : > { %642 = vperm.xlu2 %1133, %v1136_v56   ;;  %v1138_v57 = vpop.eup %1137  ;;  %v625_v12 = vmul.f32 %v1136_v56, %v623_v11 }
 0x2ab   : > { %v626_v7 = vmul.f32 %v1138_v57, %v624_v6 }
 0x2b2   : > { %647 = vperm.xlu2 %1133, %v1138_v57  }
 0x304   : > { %v643_v9 = vpop.permute.xlu2 %642 }
 0x305   : > { %v650_v20 = vmul.f32 %v643_v9, %v638_v17 }
 0x309   : > { %v615_v60 = vpop.permute.xlu1 %614 }
 0x30a   : > { %v618_v61 = vsub.f32 %v587_v41, %v615_v60 }
 0x30c   : > { %v621_v62 = vmul.f32 1.442695, %v618_v61  ;;  %v648_v16 = vpop.permute.xlu2 %647 }
 0x30d   : > { %v651_v18 = vmul.f32 %v648_v16, %v639_v15 }
 0x30e   : > { %1139 = vpow2.f32 %v621_v62 }
 0x311   : > { %v610_v63 = vpop.permute.xlu1 %609 }
 0x312   : > { %v617_v0 = vsub.f32 %v584_v43, %v610_v63 }
 0x314   : > { %v1140_v1 = vpop.eup %1139  ;;  %v619_v2 = vmul.f32 1.442695, %v617_v0 }
 0x315   : > { %958 = vmatmul.msk.f32.vlgmr.msra.gmra.mxu3 %vm592_vm4, %v1140_v1  ;;  %v630_v3 = vsel %vm592_vm4, %v1140_v1, 0.0 }
 0x316   : > { %1141 = vpow2.f32 %v619_v2  ;;  %631 = vadd.xlane.f32.xlu1 %v630_v3 }
 0x31c   : > { %v1142_v4 = vpop.eup %1141 }
 0x31d   : > { %957 = vmatmul.msk.f32.vlgmr.msra.gmra.mxu1 %vm592_vm4, %v1142_v4  ;;  %v627_v5 = vsel %vm592_vm4, %v1142_v4, 0.0 }
 0x31e   : > { %628 = vadd.xlane.f32.xlu0 %v627_v5 }
 0x389   : > { %v632_v8 = vpop.xlane.xlu1 %631 }
 0x38a   : > { %v634_v10 = vadd.f32 %v632_v8, %v626_v7 }
 0x38c   : > { %637 = vst.msk [vmem:[#allocation6 + $0x8] sm:$0xff] %vm635_vm5, %v634_v10 }
 0x391   : > { %v629_v13 = vpop.xlane.xlu0 %628 }
 0x392   : > { %v633_v14 = vadd.f32 %v629_v13, %v625_v12 }
 0x394   : > { %636 = vst.msk [vmem:[#allocation6] sm:$0xff] %vm635_vm5, %v633_v14 }
 0x398   : > { %v678_v19 = vpop.f32.mrf.mxu3 }
 0x399   : > { %v682_v21 = vadd.f32 %v678_v19, %v651_v18  ;;  %690 = sbr.rel (%p959_p0) target bundleno = 1071 (0x42f), region = 68 }
 0x39a   : > { %v675_v22 = vpop.f32.mrf.mxu1 }
 0x39b   : > { %684 = vst.msk [vmem:[#allocation7 + $0x8] sm:$0xff] %vm554_vm3, %v682_v21  ;;  %v681_v23 = vadd.f32 %v675_v22, %v650_v20 }
 0x39d   : > { %683 = vst.msk [vmem:[#allocation7] sm:$0xff] %vm554_vm3, %v681_v23 }
 0x39e   : > { %v693_v24 = vld [vmem:[#allocation6] sm:$0xff]  ;;  %v1422_v25 = vmov 0   ;;  %v694_v26 = vld [vmem:[#allocation6 + $0x8] sm:$0xff] }
 0x39f   : > { %1143 = vset.pattern.permute.xlu0 %v1422_v25 }
 0x3a0   : > { %697 = vperm.xlu0 %1143, %v693_v24  }
 0x3a2   : > { %v692_v48 = vld [vmem:[#allocation7 + $0x8] sm:$0xff] }
 0x3a4   : > { %v691_v37 = vld [vmem:[#allocation7] sm:$0xff] }
 0x3a8   : > { %702 = vperm.xlu0 %1143, %v694_v26  }
 0x412   : > { %v698_v27 = vpop.permute.xlu0 %697 }
 0x413   : > { %1144 = vrcp.f32 %v698_v27  ;;  %v716_v32 = vand.u32 2147483648, %v698_v27  ;;  %v714_v34 = vand.u32 2147483647, %v698_v27  ;;  %vm710_vm7 = vweird.f32 %v698_v27 }
 0x415   : > { %v717_v38 = vor.u32 1.1754944e-38, %v716_v32  ;;  %vm715_vm9 = vcmp.eq.f32.partialorder %v714_v34, 8.507059e+37 }
 0x419   : > { %v1145_v28 = vpop.eup %1144 }
 0x41a   : > { %v706_v29 = vmul.f32 %v1145_v28, %v698_v27  ;;  %v703_v30 = vpop.permute.xlu0 %702  ;;  %vm711_vm6 = vweird.f32 %v1145_v28 }
 0x41b   : > { %1146 = vrcp.f32 %v703_v30  ;;  %vm712_vm8 = vmor %vm710_vm7, %vm711_vm6  ;;  %v731_v44 = vand.u32 2147483648, %v703_v30  ;;  %v729_v46 = vand.u32 2147483647, %v703_v30  ;;  %vm725_vm11 = vweird.f32 %v703_v30 }
 0x41c   : > { %v707_v31 = vsub.f32 1.0, %v706_v29 }
 0x41d   : > { %v732_v49 = vor.u32 1.1754944e-38, %v731_v44  ;;  %vm730_vm13 = vcmp.eq.f32.partialorder %v729_v46, 8.507059e+37 }
 0x41e   : > { %v708_v33 = vmul.f32 %v1145_v28, %v707_v31 }
 0x420   : > { %v709_v35 = vadd.f32 %v1145_v28, %v708_v33 }
 0x421   : > { %v1147_v36 = vpop.eup %1146 }
 0x422   : > { %v713_v39 = vsel %vm712_vm8, %v1145_v28, %v709_v35  ;;  %v721_v40 = vmul.f32 %v1147_v36, %v703_v30  ;;  %vm726_vm10 = vweird.f32 %v1147_v36 }
 0x423   : > { %v718_v41 = vsel %vm715_vm9, %v717_v38, %v713_v39  ;;  %vm727_vm12 = vmor %vm725_vm11, %vm726_vm10 }
 0x424   : > { %v719_v42 = vmul.f32 %v718_v41, %v691_v37  ;;  %v722_v43 = vsub.f32 1.0, %v721_v40 }
 0x426   : > { %735 = vst.msk [vmem:[%s1695_s13] sm:$0xff] %vm554_vm3, %v719_v42  ;;  %v723_v45 = vmul.f32 %v1147_v36, %v722_v43 }
 0x428   : > { %v724_v47 = vadd.f32 %v1147_v36, %v723_v45 }
 0x42a   : > { %v728_v50 = vsel %vm727_vm12, %v1147_v36, %v724_v47 }
 0x42b   : > { %v733_v51 = vsel %vm730_vm13, %v732_v49, %v728_v50 }
 0x42c   : > { %v734_v52 = vmul.f32 %v733_v51, %v692_v48 }
 0x42e   : > { %736 = vst.msk [vmem:[%s1695_s13 + $0x8] sm:$0xff] %vm554_vm3, %v734_v52 }
 0x42f PF: > { %s1884_s16 = sld [smem:[#allocation24_spill]]  ;;  %s752_s15 = sshll.u32 %s1695_s13, 4  ;;  %s753_s15 = int_to_ptr.vmem [resolvable:$true] %s752_s15 }
 0x430   : > { %s1885_s9 = sld [smem:[#allocation25_spill]]  ;;  %s738_s25 = scalar_lea.sflag [#allocation10], %s1671_s1 }
 0x431   : > { %s1886_s27 = sld [smem:[#allocation37_spill]] }
 0x435   : > { %s961_s12 = sshll.u32 %s1884_s16, 1 }
 0x436   : > { %s962_s14 = sshll.u32 %s1885_s9, 2 }
 0x437   : > { %s749_s4 = sadd.s32 %s962_s14, %s961_s12  ;;  %s1887_s17 = smov %s1886_s27 }
 0x438   : > { %s963_s24 = sshll.u32 %s749_s4, 3  ;;  %s1288_s13 = scalar_lea.hbm %s1887_s17, 64 }
 0x439   : > { %s751_s18 = scalar_lea.hbm %s1886_s27, %s963_s24 }
 0x43a   : > { %s754_s5 = sshll.u32 %s751_s18, 4  ;;  %s755_s5 = int_to_ptr.hbm [resolvable:$true] %s754_s5 }
 0x43b   : > { %s1282_s11 = sshra.s32 %s755_s5, 4  ;;  %s1283_s11 = int_to_ptr.hbm [resolvable:$true] %s1282_s11 }
 0x43c   : > { %s1284_s2 = scalar_lea.hbm %s1283_s11, 16  ;;  %p1289_p8 = scmp.lt.s32.totalorder %s1283_s11, %s1887_s17 }
 0x43d   : > { %p1285_p4 = scmp.ne.s32.totalorder %s1283_s11, %s1284_s2  ;;  %p1290_p9 = scmp.lt.s32.totalorder %s1288_s13, %s1284_s2 }
 0x43f   : > { %p1286_p5 = pnand %p1285_p4, %p1641_p7  ;;  %p1291_p13 = por %p1290_p9, %p1289_p8 }
 0x441   : > { %p1287_p6 = pneg %p1286_p5 }
 0x443   : > { %p1292_p2 = pnand %p1291_p13, %p1287_p6 }
 0x445   : > { %1295 = shalt.err (!%p1292_p2)
}
 0x446   : > { %s1423_s1 = smov 128   ;;  %s1424_s7 = smov 8  }
 0x447   : > { %992 = dma.vmem_to_hbm [thread:$0]  (%p1641_p7), %s753_s15, 256, %s755_s5, %s738_s25, %s1423_s1, %s1423_s1, %s1424_s7  }
 0x448 PF: > { %p1015_p3 = scmp.ge.s32.totalorder %s1414_s30, 2  ;;  %s769_s9 = sand.u32 1, %s1378_s21  }
 0x449   : > { %s770_s12 = scalar_lea.sflag [#allocation10], %s769_s9 }
 0x44a   : > { %p1009_p1 = pnand %p1015_p3, %p1645_p12 }
 0x44c   : > { %p1010_p10 = pneg %p1009_p1 }
 0x44e   : > { %1361 = dma.done.wait (%p1010_p10), %s770_s12, 256  }
 0x44f   : > { %1363 = vsyncadd (%p1010_p10), %s770_s12, 4294967040  ;;  %s25_s30 = sadd.s32 1, %s1414_s30   ;;  %s1890_s8 = sld [smem:[#allocation21_spill]] }
 0x450   : > { %p1783_p11 = scmp.ge.s32.totalorder %s25_s30, 10   ;;  %s1891_s20 = sld [smem:[#allocation30_spill]] }
 0x451   : > { %s1892_s15 = sld [smem:[#allocation22_spill]]  ;;  %s1898_s18 = smov %s1370_s19 }
 0x452   : > { %s1893_s23 = sld [smem:[#allocation31_spill]]  ;;  %s1900_s21 = smov %s1382_s22 }
 0x453   : > { %s1894_s24 = sld [smem:[#allocation26_spill]]  ;;  %s1902_s25 = smov %s1406_s28 }
 0x454   : > { %s1895_s27 = sld [smem:[#allocation27_spill]]  ;;  %s1903_s26 = smov %s1410_s29 }
 0x455   : > { %s1896_s4 = sld [smem:[#allocation28_spill]]  ;;  %s1899_s19 = smov %s1890_s8 }
 0x456   : > { %s1897_s10 = sld [smem:[#allocation29_spill]] }
 0x457   : > { %s1901_s22 = smov %s1892_s15 }
 0x458   :  { %24 = sbr.rel (!%p1783_p11) target bundleno = 19 (0x13), region = 133 }
 0x45b   : > { %s1904_s28 = smov %s1896_s4 }
 0x45c   : > { %s1905_s29 = smov %s1897_s10 }
 0x45d   :  { %776 = vsyncpa [#allocation9], 1 }
 0x45e   :  { %778 = vsyncpa [#allocation9 + $0x1], 1 }
 0x45f   :  { %779 = vsyncpa [#allocation12], 1 }
 0x460   :  { %781 = vsyncpa [#allocation12 + $0x1], 1 }
 0x461   :  { %782 = vsyncpa [#allocation15], 1 }
 0x462   :  { %783 = vsyncpa [#allocation10], 1 }
 0x463   :  { %785 = vsyncpa [#allocation10 + $0x1], 1 }

</bundles_post_ra>
